<compile_context>
chip_gen: v7x
topology: tpu7x:2x2x1
jax: 0.10.0
libtpu: 0.0.40
codegen_flags: <defaults>
</compile_context>

<pallas_src>
import math

import jax
import jax.numpy as jnp
import numpy as np
from jax import lax
from jax.experimental import pallas as pl
from jax.experimental.pallas import tpu as pltpu


# ----------------------------------------------------------------------------
# Pallas kernel: one (TH, TW) output tile = 3 banded MXU matmuls + bias + PReLU
# ----------------------------------------------------------------------------
def _make_kernel(th):
    def ecb_rep_kernel(x_ref,    # (1,1,1, TH+2, (TW+2)*Cin)  bf16 haloed input tile
                       w_ref,    # (3, (TW+2)*Cin, TW*Cout)   bf16 banded folded weight
                       b_ref,    # (1, TW*Cout)               f32 folded bias (W-tiled)
                       a_ref,    # (1, TW*Cout)               f32 PReLU slope (W-tiled)
                       y_ref,    # (1, TH, TW*Cout)           bf16 output tile
                       acc_ref): # (TH, TW*Cout)              f32 VMEM accumulator
        x = x_ref[0, 0, 0]                              # (TH+2, (TW+2)*Cin), one dense load
        # LHS-shifted accumulation: all three products are (TH, TW*Cout) and land
        # at the same address (v7x MRB-friendly, no result-slice shifts).
        acc_ref[...] = jnp.dot(x[0:th], w_ref[0], preferred_element_type=jnp.float32)
        acc_ref[...] += jnp.dot(x[1:th + 1], w_ref[1], preferred_element_type=jnp.float32)
        acc_ref[...] += jnp.dot(x[2:th + 2], w_ref[2], preferred_element_type=jnp.float32)
        z = acc_ref[...] + b_ref[...]                   # (TH, n) + (1, n) broadcast
        y_ref[0] = jnp.where(z > 0, z, a_ref[...] * z).astype(y_ref.dtype)
    return ecb_rep_kernel


# ----------------------------------------------------------------------------
# Host-side helpers: branch folding (== ECB.rep_params) and banded weight
# ----------------------------------------------------------------------------
SOBEL_X = jnp.array([[1., 0., -1.], [2., 0., -2.], [1., 0., -1.]], jnp.float32)
SOBEL_Y = jnp.array([[1., 2., 1.], [0., 0., 0.], [-1., -2., -1.]], jnp.float32)
LAPLACE = jnp.array([[0., 1., 0.], [1., -4., 1.], [0., 1., 0.]], jnp.float32)
MASKS = {'sbx': SOBEL_X, 'sby': SOBEL_Y, 'lpl': LAPLACE}


def fold_rep_params(p):
    """Fold the 5 ECB branches into one 3x3 conv (HWIO) + bias, == ECB.rep_params()."""
    rep_w = p['w3']                                     # (3, 3, Cin, Cout)
    rep_b = p['b3']                                     # (Cout,)
    # conv1x1 -> conv3x3 branch
    rep_w = rep_w + jnp.einsum('im,yxmo->yxio', p['k0a'], p['k1a'])
    rep_b = rep_b + jnp.einsum('m,yxmo->o', p['b0a'], p['k1a']) + p['b1a']
    # conv1x1 -> masked depthwise 3x3 branches (sobelx / sobely / laplacian)
    for e in ('sbx', 'sby', 'lpl'):
        mask = MASKS[e]
        rep_w = rep_w + (mask[:, :, None, None]
                         * p[f'scale_{e}'][None, None, None, :]
                         * p[f'k0_{e}'][None, None, :, :])
        rep_b = rep_b + p[f'bias_{e}'] + mask.sum() * p[f'scale_{e}'] * p[f'b0_{e}']
    return rep_w, rep_b


def build_banded_weight(rep_w, tw):
    """Expand a 3x3 HWIO weight into 3 banded matrices for one W-tile.

    wmat[dy, (w+dx)*Cin + ci, w*Cout + co] = rep_w[dy, dx, ci, co]
    so a (TW+2, Cin)-lane-flattened padded input window is convolved with three
    lane-dense matmuls (one per kernel row).  The same matrix serves every
    W-tile because each tile's input window carries its own +-1 column halo.
    """
    kh, kw, cin, cout = rep_w.shape
    wp = tw + 2
    place = np.zeros((kw, tw, wp), np.float32)          # place[dx, w, w+dx] = 1
    for dx in range(kw):
        place[dx, np.arange(tw), np.arange(tw) + dx] = 1.0
    wmat = jnp.einsum('xwk,yxio->ykiwo', jnp.asarray(place), rep_w)
    return wmat.reshape(kh, wp * cin, tw * cout)


def prepare_ecb_weights(p, tw):
    """One-time (weight-load-time) preparation; NOT part of the per-call forward."""
    rep_w, rep_b = fold_rep_params(p)
    wmat = build_banded_weight(rep_w, tw).astype(jnp.bfloat16)   # (3, (TW+2)*Cin, TW*Cout)
    b_tiled = jnp.tile(rep_b, tw)[None, :].astype(jnp.float32)   # (1, TW*Cout)
    a_tiled = jnp.tile(p['alpha'], tw)[None, :].astype(jnp.float32)
    return wmat, b_tiled, a_tiled


def choose_tiles(h, w, cin, cout, row_target=64, lane_target=512):
    """Pick (TH, TW). TW*Cout stays a multiple of 128 whenever W is actually tiled."""
    tw = max(1, min(w, lane_target // max(cout, 1)))
    if tw < w:
        step = 128 // math.gcd(cout, 128)
        tw = max(step, (tw // step) * step)
        if tw >= w:
            tw = w
    th = min(h, row_target)
    if th < h:
        th = max(8, (th // 8) * 8)
    return th, tw


def init_params(key, cin, cout, mid):
    """Deterministic synthetic parameters matching ECB.__init__ shapes."""
    keys = jax.random.split(key, 20)
    nrm = lambda k, shape, s=0.1: jax.random.normal(k, shape, jnp.float32) * s
    p = {}
    p['w3'] = nrm(keys[0], (3, 3, cin, cout))            # plain conv3x3 weight (HWIO)
    p['b3'] = nrm(keys[1], (cout,))
    p['k0a'] = nrm(keys[2], (cin, mid))                  # 1x1 conv weight
    p['b0a'] = nrm(keys[3], (mid,))
    p['k1a'] = nrm(keys[4], (3, 3, mid, cout))           # 3x3 conv weight (HWIO)
    p['b1a'] = nrm(keys[5], (cout,))
    idx = 6
    for e in ('sbx', 'sby', 'lpl'):
        p[f'k0_{e}'] = nrm(keys[idx], (cin, cout)); idx += 1
        p[f'b0_{e}'] = nrm(keys[idx], (cout,)); idx += 1
        p[f'scale_{e}'] = nrm(keys[idx], (cout,), 0.001); idx += 1
        p[f'bias_{e}'] = nrm(keys[idx], (cout,), 0.001); idx += 1
    p['alpha'] = jnp.full((cout,), 0.25, jnp.float32)    # PReLU default init
    return p


# ----------------------------------------------------------------------------
# Forward builder (shapes/tiles are static; returns a jitted forward)
# ----------------------------------------------------------------------------
def make_ecb_forward(n, h, w, cin, cout, th, tw):
    nhb = -(-h // th)
    nwb = -(-w // tw)
    hp, wp = nhb * th, nwb * tw
    twcin = (tw + 2) * cin
    twcout = tw * cout

    # Static overlapping-window indices (halo duplication only; see TODO above).
    ridx = (np.arange(nhb)[:, None] * th + np.arange(th + 2)[None, :]).reshape(-1)
    cidx = (np.arange(nwb)[:, None] * tw + np.arange(tw + 2)[None, :]).reshape(-1)

    kernel = _make_kernel(th)

    call = pl.pallas_call(
        kernel,
        out_shape=jax.ShapeDtypeStruct((n, hp, nwb * twcout), jnp.bfloat16),
        grid=(n, nhb, nwb),
        in_specs=[
            pl.BlockSpec((1, 1, 1, th + 2, twcin), lambda b, i, j: (b, i, j, 0, 0)),
            pl.BlockSpec((3, twcin, twcout), lambda b, i, j: (0, 0, 0)),
            pl.BlockSpec((1, twcout), lambda b, i, j: (0, 0)),
            pl.BlockSpec((1, twcout), lambda b, i, j: (0, 0)),
        ],
        out_specs=pl.BlockSpec((1, th, twcout), lambda b, i, j: (b, i, j)),
        scratch_shapes=[pltpu.VMEM((th, twcout), jnp.float32)],
        compiler_params=pltpu.CompilerParams(
            dimension_semantics=("parallel", "parallel", "parallel"),
            vmem_limit_bytes=32 * 1024 * 1024),
    )

    @jax.jit
    def forward(x_nchw, wmat, b_tiled, a_tiled):
        # NCHW -> NHWC (kept only for PyTorch API parity; internals are NHWC).
        x = jnp.transpose(x_nchw, (0, 2, 3, 1)).astype(jnp.float32)
        # SAME zero pad + round-up padding to tile multiples, cast to bf16 (one pass).
        xpad = jnp.pad(x, ((0, 0), (1, 1 + hp - h), (1, 1 + wp - w), (0, 0)))
        xpad = xpad.astype(jnp.bfloat16)                                 # (n, hp+2, wp+2, cin)
        # Overlapping (TH+2)-row / (TW+2)-col windows, folded lane-dense.
        xg = xpad[:, ridx][:, :, cidx]                                   # (n, nhb*(th+2), nwb*(tw+2), cin)
        xg = xg.reshape(n, nhb, th + 2, nwb, tw + 2, cin)
        xg = xg.transpose(0, 1, 3, 2, 4, 5).reshape(n, nhb, nwb, th + 2, twcin)

        y = call(xg, wmat, b_tiled, a_tiled)                             # (n, hp, nwb*tw*cout) bf16

        y = y[:, :h, :w * cout].reshape(n, h, w, cout)
        return jnp.transpose(y, (0, 3, 1, 2)).astype(jnp.float32)        # NHWC -> NCHW

    return forward


# ----------------------------------------------------------------------------
# Pure-JAX reference reproducing the PyTorch training-mode forward branch-by-branch
# ----------------------------------------------------------------------------
def ecb_reference(x_nchw, p):
    dn = ('NHWC', 'HWIO', 'NHWC')
    x = jnp.transpose(x_nchw, (0, 2, 3, 1)).astype(jnp.float32)
    cin = x.shape[-1]
    cout = p['w3'].shape[-1]
    mid = p['k0a'].shape[-1]

    def conv(inp, w, padding, groups=1):
        return lax.conv_general_dilated(inp, w, (1, 1), padding,
                                        dimension_numbers=dn,
                                        feature_group_count=groups)

    def pad_border(y0, b):
        _, hh, ww, _ = y0.shape
        yp = jnp.pad(y0, ((0, 0), (1, 1), (1, 1), (0, 0)))
        ii = jnp.arange(hh + 2)[:, None]
        jj = jnp.arange(ww + 2)[None, :]
        border = (ii == 0) | (ii == hh + 1) | (jj == 0) | (jj == ww + 1)
        return jnp.where(border[None, :, :, None], b[None, None, None, :], yp)

    y = conv(x, p['w3'], 'SAME') + p['b3']

    y0 = conv(x, p['k0a'].reshape(1, 1, cin, mid), 'VALID') + p['b0a']
    y0 = pad_border(y0, p['b0a'])
    y = y + conv(y0, p['k1a'], 'VALID') + p['b1a']

    for e in ('sbx', 'sby', 'lpl'):
        y0 = conv(x, p[f'k0_{e}'].reshape(1, 1, cin, cout), 'VALID') + p[f'b0_{e}']
        y0 = pad_border(y0, p[f'b0_{e}'])
        wdw = (MASKS[e][:, :, None] * p[f'scale_{e}'][None, None, :])[:, :, None, :]
        y = y + conv(y0, wdw, 'VALID', groups=cout) + p[f'bias_{e}']

    y = jnp.where(y > 0, y, p['alpha'] * y)
    return jnp.transpose(y, (0, 3, 1, 2))


if __name__ == "__main__":
    key = jax.random.PRNGKey(0)
    kx, kp, kx2 = jax.random.split(key, 3)
    N, Cin, Cout, H, W, depth_multiplier = 2, 4, 8, 16, 16, 2
    Mid = Cout * depth_multiplier

    x = jax.random.normal(kx, (N, Cin, H, W), jnp.float32)        # NCHW like PyTorch
    params = init_params(kp, Cin, Cout, Mid)

    # --- config 1: auto-chosen tiles (single tile per image at this small size) ---
    th, tw = choose_tiles(H, W, Cin, Cout)
    wmat, b_t, a_t = prepare_ecb_weights(params, tw)              # hoisted, load-time prep
    fwd = make_ecb_forward(N, H, W, Cin, Cout, th, tw)
    y = fwd(x, wmat, b_t, a_t)
    jax.block_until_ready(y)
    y_ref = ecb_reference(x, params)
    # bf16 matmul operands + bf16 output (f32 accumulation) vs f32 multi-branch reference.
    np.testing.assert_allclose(np.asarray(y), np.asarray(y_ref), rtol=2e-2, atol=2e-2)

    # --- config 2: exercise the multi-tile H/W grid (2x2 blocks per image) ---
    N2, H2, W2 = 1, 16, 32
    th2, tw2 = 8, 16                                              # TW*Cout = 128 (lane dense)
    x2 = jax.random.normal(kx2, (N2, Cin, H2, W2), jnp.float32)
    wmat2, b_t2, a_t2 = prepare_ecb_weights(params, tw2)
    fwd2 = make_ecb_forward(N2, H2, W2, Cin, Cout, th2, tw2)
    y2 = fwd2(x2, wmat2, b_t2, a_t2)
    jax.block_until_ready(y2)
    y2_ref = ecb_reference(x2, params)
    np.testing.assert_allclose(np.asarray(y2), np.asarray(y2_ref), rtol=2e-2, atol=2e-2)

    print("KERNEL_OK")
</pallas_src>

<mosaic_0001>
module attributes {stable_mosaic.version = 11 : i64} {
  func.func @ecb_rep_kernel(%arg0: i32, %arg1: i32, %arg2: i32, %arg3: memref<1x1x1x18x72xbf16, #tpu.memory_space<vmem>>, %arg4: memref<3x72x128xbf16, #tpu.memory_space<vmem>>, %arg5: memref<1x128xf32, #tpu.memory_space<vmem>>, %arg6: memref<1x128xf32, #tpu.memory_space<vmem>>, %arg7: memref<1x16x128xbf16, #tpu.memory_space<vmem>>, %arg8: memref<16x128xf32, #tpu.memory_space<vmem>>) attributes {dimension_semantics = [#tpu.dimension_semantics<parallel>, #tpu.dimension_semantics<parallel>, #tpu.dimension_semantics<parallel>], iteration_bounds = array<i64: 2, 1, 1>, scalar_prefetch = 0 : i64, scratch_operands = 1 : i64, tpu.core_type = #tpu.core_type<tc>, window_params = [{transform_indices = @transform_0, window_bounds = array<i64: 1, 1, 1, 18, 72>}, {pipeline_mode = #tpu.pipeline_mode<synchronous>, transform_indices = @transform_1, window_bounds = array<i64: 3, 72, 128>}, {pipeline_mode = #tpu.pipeline_mode<synchronous>, transform_indices = @transform_2, window_bounds = array<i64: 1, 128>}, {pipeline_mode = #tpu.pipeline_mode<synchronous>, transform_indices = @transform_3, window_bounds = array<i64: 1, 128>}, {transform_indices = @transform_4, window_bounds = array<i64: 1, 16, 128>}]} {
    %c0 = arith.constant 0 : index
    %c0_0 = arith.constant 0 : index
    %c0_1 = arith.constant 0 : index
    %c0_2 = arith.constant 0 : index
    %c0_3 = arith.constant 0 : index
    %0 = vector.load %arg3[%c0, %c0_0, %c0_1, %c0_2, %c0_3] : memref<1x1x1x18x72xbf16, #tpu.memory_space<vmem>>, vector<1x1x1x18x72xbf16>
    %1 = vector.shape_cast %0 : vector<1x1x1x18x72xbf16> to vector<18x72xbf16>
    %2 = vector.extract_strided_slice %1 {offsets = [0, 0], sizes = [16, 72], strides = [1, 1]} : vector<18x72xbf16> to vector<16x72xbf16>
    %c0_4 = arith.constant 0 : index
    %c0_5 = arith.constant 0 : index
    %c0_6 = arith.constant 0 : index
    %3 = vector.load %arg4[%c0_4, %c0_5, %c0_6] : memref<3x72x128xbf16, #tpu.memory_space<vmem>>, vector<1x72x128xbf16>
    %4 = vector.shape_cast %3 : vector<1x72x128xbf16> to vector<72x128xbf16>
    %cst = arith.constant dense<0.000000e+00> : vector<16x128xf32>
    %5 = tpu.matmul %2, %4, %cst {dimension_numbers = #tpu.dot_dimension_numbers<[1], [0], [0], [1], [0, 0, 1, 1], [], []>} : vector<16x72xbf16>, vector<72x128xbf16>, vector<16x128xf32> -> vector<16x128xf32>
    %c0_7 = arith.constant 0 : index
    %c0_8 = arith.constant 0 : index
    %6 = vector.load %arg8[%c0_7, %c0_8] : memref<16x128xf32, #tpu.memory_space<vmem>>, vector<16x128xf32>
    tpu.vector_store %arg8[%c0_7, %c0_8], %5 {strides = array<i32>} : memref<16x128xf32, #tpu.memory_space<vmem>>, vector<16x128xf32>,
    %c0_9 = arith.constant 0 : index
    %c0_10 = arith.constant 0 : index
    %7 = vector.load %arg8[%c0_9, %c0_10] : memref<16x128xf32, #tpu.memory_space<vmem>>, vector<16x128xf32>
    %8 = vector.extract_strided_slice %1 {offsets = [1, 0], sizes = [16, 72], strides = [1, 1]} : vector<18x72xbf16> to vector<16x72xbf16>
    %c1 = arith.constant 1 : index
    %c0_11 = arith.constant 0 : index
    %c0_12 = arith.constant 0 : index
    %9 = vector.load %arg4[%c1, %c0_11, %c0_12] : memref<3x72x128xbf16, #tpu.memory_space<vmem>>, vector<1x72x128xbf16>
    %10 = vector.shape_cast %9 : vector<1x72x128xbf16> to vector<72x128xbf16>
    %cst_13 = arith.constant dense<0.000000e+00> : vector<16x128xf32>
    %11 = tpu.matmul %8, %10, %cst_13 {dimension_numbers = #tpu.dot_dimension_numbers<[1], [0], [0], [1], [0, 0, 1, 1], [], []>} : vector<16x72xbf16>, vector<72x128xbf16>, vector<16x128xf32> -> vector<16x128xf32>
    %12 = arith.addf %7, %11 : vector<16x128xf32>
    %c0_14 = arith.constant 0 : index
    %c0_15 = arith.constant 0 : index
    %13 = vector.load %arg8[%c0_14, %c0_15] : memref<16x128xf32, #tpu.memory_space<vmem>>, vector<16x128xf32>
    tpu.vector_store %arg8[%c0_14, %c0_15], %12 {strides = array<i32>} : memref<16x128xf32, #tpu.memory_space<vmem>>, vector<16x128xf32>,
    %c0_16 = arith.constant 0 : index
    %c0_17 = arith.constant 0 : index
    %14 = vector.load %arg8[%c0_16, %c0_17] : memref<16x128xf32, #tpu.memory_space<vmem>>, vector<16x128xf32>
    %15 = vector.extract_strided_slice %1 {offsets = [2, 0], sizes = [16, 72], strides = [1, 1]} : vector<18x72xbf16> to vector<16x72xbf16>
    %c2 = arith.constant 2 : index
    %c0_18 = arith.constant 0 : index
    %c0_19 = arith.constant 0 : index
    %16 = vector.load %arg4[%c2, %c0_18, %c0_19] : memref<3x72x128xbf16, #tpu.memory_space<vmem>>, vector<1x72x128xbf16>
    %17 = vector.shape_cast %16 : vector<1x72x128xbf16> to vector<72x128xbf16>
    %cst_20 = arith.constant dense<0.000000e+00> : vector<16x128xf32>
    %18 = tpu.matmul %15, %17, %cst_20 {dimension_numbers = #tpu.dot_dimension_numbers<[1], [0], [0], [1], [0, 0, 1, 1], [], []>} : vector<16x72xbf16>, vector<72x128xbf16>, vector<16x128xf32> -> vector<16x128xf32>
    %19 = arith.addf %14, %18 : vector<16x128xf32>
    %c0_21 = arith.constant 0 : index
    %c0_22 = arith.constant 0 : index
    %20 = vector.load %arg8[%c0_21, %c0_22] : memref<16x128xf32, #tpu.memory_space<vmem>>, vector<16x128xf32>
    tpu.vector_store %arg8[%c0_21, %c0_22], %19 {strides = array<i32>} : memref<16x128xf32, #tpu.memory_space<vmem>>, vector<16x128xf32>,
    %c0_23 = arith.constant 0 : index
    %c0_24 = arith.constant 0 : index
    %21 = vector.load %arg8[%c0_23, %c0_24] : memref<16x128xf32, #tpu.memory_space<vmem>>, vector<16x128xf32>
    %c0_25 = arith.constant 0 : index
    %c0_26 = arith.constant 0 : index
    %22 = vector.load %arg5[%c0_25, %c0_26] : memref<1x128xf32, #tpu.memory_space<vmem>>, vector<1x128xf32>
    %23 = vector.broadcast %22 : vector<1x128xf32> to vector<16x128xf32>
    %24 = arith.addf %21, %23 : vector<16x128xf32>
    %cst_27 = arith.constant 0.000000e+00 : f32
    %25 = vector.broadcast %cst_27 : f32 to vector<16x128xf32>
    %26 = arith.cmpf ogt, %24, %25 : vector<16x128xf32>
    %c0_28 = arith.constant 0 : index
    %c0_29 = arith.constant 0 : index
    %27 = vector.load %arg6[%c0_28, %c0_29] : memref<1x128xf32, #tpu.memory_space<vmem>>, vector<1x128xf32>
    %28 = vector.broadcast %27 : vector<1x128xf32> to vector<16x128xf32>
    %29 = arith.mulf %28, %24 : vector<16x128xf32>
    %30 = arith.select %26, %24, %29 : vector<16x128xi1>, vector<16x128xf32>
    %31 = arith.truncf %30 : vector<16x128xf32> to vector<16x128xbf16>
    %c0_30 = arith.constant 0 : index
    %c0_31 = arith.constant 0 : index
    %c0_32 = arith.constant 0 : index
    %32 = vector.load %arg7[%c0_30, %c0_31, %c0_32] : memref<1x16x128xbf16, #tpu.memory_space<vmem>>, vector<1x16x128xbf16>
    %33 = vector.shape_cast %32 : vector<1x16x128xbf16> to vector<16x128xbf16>
    %34 = vector.shape_cast %31 : vector<16x128xbf16> to vector<1x16x128xbf16>
    tpu.vector_store %arg7[%c0_30, %c0_31, %c0_32], %34 {strides = array<i32>} : memref<1x16x128xbf16, #tpu.memory_space<vmem>>, vector<1x16x128xbf16>,
    return
  }
  func.func @transform_0(%arg0: i32, %arg1: i32, %arg2: i32) -> (i32, i32, i32, i32, i32) {
    %c0_i32 = arith.constant 0 : i32
    %c0_i32_0 = arith.constant 0 : i32
    %c0_i32_1 = arith.constant 0 : i32
    return %arg0, %arg1, %arg2, %c0_i32, %c0_i32_0 : i32, i32, i32, i32, i32
  }
  func.func @transform_1(%arg0: i32, %arg1: i32, %arg2: i32) -> (i32, i32, i32) {
    %c0_i32 = arith.constant 0 : i32
    %c0_i32_0 = arith.constant 0 : i32
    %c0_i32_1 = arith.constant 0 : i32
    %c0_i32_2 = arith.constant 0 : i32
    return %c0_i32, %c0_i32_0, %c0_i32_1 : i32, i32, i32
  }
  func.func @transform_2(%arg0: i32, %arg1: i32, %arg2: i32) -> (i32, i32) {
    %c0_i32 = arith.constant 0 : i32
    %c0_i32_0 = arith.constant 0 : i32
    %c0_i32_1 = arith.constant 0 : i32
    return %c0_i32, %c0_i32_0 : i32, i32
  }
  func.func @transform_3(%arg0: i32, %arg1: i32, %arg2: i32) -> (i32, i32) {
    %c0_i32 = arith.constant 0 : i32
    %c0_i32_0 = arith.constant 0 : i32
    %c0_i32_1 = arith.constant 0 : i32
    return %c0_i32, %c0_i32_0 : i32, i32
  }
  func.func @transform_4(%arg0: i32, %arg1: i32, %arg2: i32) -> (i32, i32, i32) {
    %c0_i32 = arith.constant 0 : i32
    return %arg0, %arg1, %arg2 : i32, i32, i32
  }
}

</mosaic_0001>

<bundles_post_ra>
// kernel: forward.1
= control target key start
LH: loop header
LB: loop body
LE: loop exit
PB: predicated region body
PF: predicated region fallthrough
CT: control target
= control target key end

     0   :  { %s917_s15 = smov 0   ;;  %s919_s16 = smov 0   ;;  %s1032_s0 = inlined_call_operand.vmem [shape: bf16[2,1,1,18,72], index: 0, kind: input, shape index: {}]   ;;  %s1033_s1 = inlined_call_operand.vmem [shape: bf16[3,72,128], index: 1, kind: input, shape index: {}]   ;;  %s1034_s2 = inlined_call_operand.vmem [shape: f32[1,128], index: 2, kind: input, shape index: {}]   ;;  %s1035_s3 = inlined_call_operand.vmem [shape: f32[1,128], index: 3, kind: input, shape index: {}]   ;;  %s1036_s4 = inlined_call_operand.vmem [shape: bf16[2,16,128], index: 4, kind: output, shape index: {}]  }
   0x1   :  { %s921_s17 = smov 0  }
   0x2 LB: > { %s33_s18 = sadd.s32 1, %s884_s16  ;;  %p706_p0 = scmp.ge.s32.totalorder %s888_s17, 1  ;;  %s888_s17 = sphi %s921_s17, %s14_s17   ;;  %s884_s16 = sphi %s919_s16, %s1038_s16   ;;  %s880_s15 = sphi %s917_s15, %s1037_s15  }
   0x3   : > { %p35_p1 = scmp.ge.s32.totalorder %s33_s18, 2  ;;  %p197_p2 = scmp.lt.s32.totalorder %s888_s17, 3 }
   0x5   : > { %s1040_s18 = smov (%p35_p1, %s33_s18), 0  ;;  %p198_p3 = pnand %p706_p0, %p197_p2 }
   0x6   : > { %v849_v0 = vld [vmem:[%s1033_s1] sm:$0xff] (!%p198_p3)   ;;  %v890_v1 = vmov (!%p198_p3), 0.0   ;;  %v851_v3 = vld [vmem:[%s1033_s1 + $0x8] sm:$0xff] (!%p198_p3)   ;;  %p238_p4 = scmp.lt.s32.totalorder (!%p198_p3), %s880_s15, 1  ;;  %vm891_vm0 = vmmov (!%p198_p3), 0   ;;  %v853_v5 = vld [vmem:[%s1033_s1 + $0x10] sm:$0xff] (!%p198_p3)  }
   0x7   : > { %201 = sbr.rel (%p198_p3) target bundleno = 271 (0x10f), region = 36  ;;  %780 = vmatprep.subr.bf16.mxu0 (!%p198_p3), %v890_v1  ;;  %794 = vmatprep.subr.bf16.mxu1 (!%p198_p3), %v890_v1  ;;  %v850_v2 = vld [vmem:[%s1033_s1 + $0x24] sm:$0xff] (!%p198_p3)   ;;  %v852_v4 = vld [vmem:[%s1033_s1 + $0x2c] sm:$0xff] (!%p198_p3)   ;;  %v854_v6 = vld [vmem:[%s1033_s1 + $0x34] sm:$0xff] (!%p198_p3)   ;;  %vm313_vm1 = vcmask (!%p198_p3), 1043456   ;;  %vm309_vm3 = vcmask (!%p198_p3), 588800  }
   0x8   : > { %781 = vmatpush3.bf16.msra.mxu0 (!%p198_p3), %v849_v0  ;;  %795 = vmatpush3.bf16.msra.mxu1 (!%p198_p3), %v850_v2  ;;  %v855_v7 = vld [vmem:[%s1033_s1 + $0x18] sm:$0xff] (!%p198_p3)   ;;  %v857_v8 = vld [vmem:[%s1033_s1 + $0x20] ss:$0 sps:$4 sm:$0xff] (!%p198_p3)   ;;  %v858_v12 = vld [vmem:[%s1033_s1 + $0x44] ss:$0 sps:$4 sm:$0xff] (!%p198_p3)   ;;  %vm477_vm4 = vcmask (!%p198_p3), 1046528  }
   0x9   : > { %782 = vmatprep.subr.bf16.mxu0 (!%p198_p3), %v890_v1  ;;  %796 = vmatprep.subr.bf16.mxu1 (!%p198_p3), %v890_v1  ;;  %v856_v10 = vld [vmem:[%s1033_s1 + $0x3c] sm:$0xff] (!%p198_p3)   ;;  %v315_v17 = vsel (!%p198_p3), %vm313_vm1, %v857_v8, 0  ;;  %v418_v19 = vsel (!%p198_p3), %vm313_vm1, %v858_v12, 0  ;;  %vm375_vm2 = vsmask.f32 (!%p198_p3), 7424  ;;  %v861_v21 = vld [vmem:[%s1033_s1 + $0x48] sm:$0xff] (!%p198_p3)  }
   0xa   : > { %790 = vmatprep.mubr.msk.bf16.mxu0 (!%p198_p3), %vm891_vm0, %v890_v1  ;;  %804 = vmatprep.mubr.msk.bf16.mxu1 (!%p198_p3), %vm891_vm0, %v890_v1  ;;  %v862_v23 = vld [vmem:[%s1033_s1 + $0x50] sm:$0xff] (!%p198_p3)   ;;  %v863_v24 = vld [vmem:[%s1033_s1 + $0x58] sm:$0xff] (!%p198_p3)   ;;  %v864_v25 = vld [vmem:[%s1033_s1 + $0x60] sm:$0xff] (!%p198_p3)  }
   0xb   : > { %v865_v26 = vld [vmem:[%s1033_s1 + $0x68] ss:$0 sps:$4 sm:$0xff] (!%p198_p3)   ;;  %v748_v42 = vld [vmem:[%s1034_s2] ss:$0 sm:$0xff] (!%p198_p3) }
   0xc   : > { %783 = vmatpush3.bf16.msra.mxu0 (!%p198_p3), %v851_v3  ;;  %797 = vmatpush3.bf16.msra.mxu1 (!%p198_p3), %v852_v4  ;;  %v512_v29 = vsel (!%p198_p3), %vm313_vm1, %v865_v26, 0  ;;  %v749_v45 = vld [vmem:[%s1035_s3] ss:$0 sm:$0xff] (!%p198_p3) }
   0xd   : > { %784 = vmatprep.subr.bf16.mxu0 (!%p198_p3), %v890_v1  ;;  %798 = vmatprep.subr.bf16.mxu1 (!%p198_p3), %v890_v1 }
   0xe   : > { %s1042_s15 = smov (!%p238_p4, %s880_s15), 1 }
   0xf   : > { %s822_s5 = smul.u32 12, %s1042_s15  ;;  %s754_s9 = sshll.u32 %s1042_s15, 3 }
  0x10   : > { %785 = vmatpush3.bf16.msra.mxu0 %v853_v5  ;;  %799 = vmatpush3.bf16.msra.mxu1 %v854_v6 }
  0x11   : > { %s250_s12 = scalar_lea.vmem %s1032_s0, %s822_s5  ;;  %786 = vmatprep.subr.bf16.mxu0 %v890_v1  ;;  %800 = vmatprep.subr.bf16.mxu1 %v890_v1 }
  0x12   : > { %v859_v9 = vld [vmem:[%s250_s12] sm:$0xff]   ;;  %v860_v11 = vld [vmem:[%s250_s12 + $0x8] ss:$0 sps:$4 sm:$0x11]   ;;  %s262_s12 = scalar_lea.vmem %s1036_s4, %s754_s9 }
  0x13   : > { %v376_v13 = vshrl.u32 %v859_v9, 16  ;;  %v378_v14 = vshll.u32 %v859_v9, 16  ;;  %v383_v15 = vshll.u32 %v860_v11, 16  ;;  %v478_v27 = vrot.slane %v859_v9, 1 }
  0x14   : > { %787 = vmatpush3.bf16.msra.mxu0 %v855_v7  ;;  %801 = vmatpush3.bf16.msra.mxu1 %v856_v10  ;;  %v479_v28 = vrot.slane %v860_v11, 1 }
  0x15   : > { %v380_v16 = vrot.slane %v378_v14, 1  ;;  %788 = vmatprep.subr.bf16.mxu0 %v890_v1  ;;  %v385_v18 = vrot.slane %v383_v15, 1  ;;  %802 = vmatprep.subr.bf16.mxu1 %v890_v1 }
  0x16   : > { %v480_v30 = vsel %vm477_vm4, %v478_v27, %v479_v28 }
  0x17   : > { %v381_v20 = vor.u32 %v380_v16, %v376_v13 }
  0x18   : > { %789 = vmatpush3.bf16.msra.mxu0 %v315_v17  ;;  %803 = vmatpush3.bf16.msra.mxu1 %v418_v19 }
  0x19   : > { %v386_v22 = vsel %vm375_vm2, %v381_v20, %v385_v18  ;;  %808 = vmatprep.subr.bf16.mxu0 %v890_v1 }
  0x1b   : > { %791 = vmatmul.mubr.msk.bf16.vlgmr.msra.gmra.mrb[0].mxu0 %vm309_vm3, %v859_v9  ;;  %805 = vmatmul.mubr.msk.bf16.vlgmr.msra.gmra.mrb[0].mxu1 %vm309_vm3, %v386_v22 }
  0x1c   : > { %809 = vmatpush3.bf16.msra.mxu0 %v861_v21  ;;  %818 = vmatprep.mubr.msk.bf16.mxu0 %vm891_vm0, %v890_v1 }
  0x1d   : > { %810 = vmatprep.subr.bf16.mxu0 %v890_v1 }
  0x20   : > { %811 = vmatpush3.bf16.msra.mxu0 %v862_v23 }
  0x21   : > { %812 = vmatprep.subr.bf16.mxu0 %v890_v1 }
  0x24   : > { %813 = vmatpush3.bf16.msra.mxu0 %v863_v24 }
  0x25   : > { %814 = vmatprep.subr.bf16.mxu0 %v890_v1 }
  0x28   : > { %815 = vmatpush3.bf16.msra.mxu0 %v864_v25 }
  0x29   : > { %816 = vmatprep.subr.bf16.mxu0 %v890_v1 }
  0x2c   : > { %817 = vmatpush3.bf16.msra.mxu0 %v512_v29 }
  0x2f   : > { %819 = vmatmul.mubr.msk.bf16.vlgmr.msra.gmra.mrb[4].mxu0 %vm309_vm3, %v480_v30 }
  0xee   : > { %v351_v31 = vpop.f32.mrb[0].mxu0  ;;  %v454_v32 = vpop.f32.mrb[0].mxu1 }
  0xef   : > { %v792_v33 = vpop.f32.mrb[1].mxu0  ;;  %v461_v34 = vadd.f32 %v454_v32, %v351_v31  ;;  %v806_v35 = vpop.f32.mrb[1].mxu1 }
  0xf0   : > { %v354_v36 = vpop.f32.mrb[2].mxu0  ;;  %v457_v37 = vpop.f32.mrb[2].mxu1 }
  0xf1   : > { %v793_v38 = vpop.f32.mrb[3].mxu0  ;;  %v462_v39 = vadd.f32 %v457_v37, %v354_v36  ;;  %v807_v40 = vpop.f32.mrb[3].mxu1 }
 0x102   : > { %v548_v41 = vpop.f32.mrb[4].mxu0 }
 0x103   : > { %v555_v43 = vadd.f32 %v548_v41, %v461_v34  ;;  %v820_v44 = vpop.f32.mrb[5].mxu0 }
 0x104   : > { %v551_v46 = vpop.f32.mrb[6].mxu0 }
 0x105   : > { %v568_v47 = vadd.f32 %v748_v42, %v555_v43  ;;  %v556_v48 = vadd.f32 %v551_v46, %v462_v39  ;;  %v821_v49 = vpop.f32.mrb[7].mxu0 }
 0x107   : > { %v579_v50 = vmul.f32 %v749_v45, %v568_v47  ;;  %v569_v51 = vadd.f32 %v748_v42, %v556_v48  ;;  %vm570_vm5 = vcmp.gt.f32.partialorder %v568_v47, 0.0 }
 0x109   : > { %vm571_vm6 = vcmp.gt.f32.partialorder %v569_v51, 0.0  ;;  %v580_v52 = vmul.f32 %v749_v45, %v569_v51  ;;  %v581_v53 = vsel %vm570_vm5, %v568_v47, %v579_v50 }
 0x10b   : > { %v582_v54 = vsel %vm571_vm6, %v569_v51, %v580_v52 }
 0x10c   : > { %v760_v55 = vpack.c.bf16 %v582_v54, %v581_v53 }
 0x10e   : > { %761 = vst [vmem:[%s262_s12] sm:$0xff] %v760_v55  }
 0x10f PF: > { %s14_s17 = sadd.s32 1, %s888_s17   ;;  %s1037_s15 = smov %s884_s16 }
 0x110   : > { %p11_p5 = scmp.ge.s32.totalorder %s14_s17, 4   ;;  %s1038_s16 = smov %s1040_s18 }
 0x112   :  { %13 = sbr.rel (!%p11_p5) target bundleno = 2 (0x2), region = 68 }

</bundles_post_ra>
